<compile_context>
chip_gen: v7x
topology: tpu7x:2x2x1
jax: 0.10.0
libtpu: 0.0.40
codegen_flags: <defaults>
</compile_context>

<pallas_src>
import functools

import jax
import jax.numpy as jnp
from jax.experimental import pallas as pl
from jax.experimental.pallas import tpu as pltpu

F32 = jnp.float32
BF16 = jnp.bfloat16
# 48 MiB scoped VMEM: safe on v7x (64 MiB physical per TC), plenty of headroom
# on v5e / v6e (128 MiB).
VMEM_LIMIT = 48 * 1024 * 1024


# --------------------------------------------------------------------------
# Generic linear (tiled over N when large, so weight DMA pipelines with MXU)
# --------------------------------------------------------------------------
def _linear_kernel(x_ref, w_ref, b_ref, o_ref, *, relu):
    y = jnp.dot(x_ref[...], w_ref[...], preferred_element_type=jnp.float32)
    y = y + b_ref[...]
    if relu:
        y = jnp.maximum(y, 0.0)
    o_ref[...] = y


def linear(x, w, b, relu=False, block_n=256):
    """y = x @ w + b (optional ReLU).  x:(M,K)  w:(K,N)  b:(1,N) -> (M,N) f32."""
    M, K = x.shape
    N = w.shape[1]
    if w.dtype == BF16:
        x = x.astype(BF16)
    kernel = functools.partial(_linear_kernel, relu=relu)
    if N % block_n == 0 and N > block_n:
        # Grid over output columns: weight tile DMA overlaps compute, and the
        # "parallel" axis shards across both TensorCores on v7x.
        return pl.pallas_call(
            kernel,
            out_shape=jax.ShapeDtypeStruct((M, N), F32),
            grid_spec=pltpu.PrefetchScalarGridSpec(
                num_scalar_prefetch=0,
                grid=(N // block_n,),
                in_specs=[
                    pl.BlockSpec((M, K), lambda j: (0, 0)),
                    pl.BlockSpec((K, block_n), lambda j: (0, j)),
                    pl.BlockSpec((1, block_n), lambda j: (0, j)),
                ],
                out_specs=pl.BlockSpec((M, block_n), lambda j: (0, j)),
            ),
            compiler_params=pltpu.CompilerParams(
                dimension_semantics=("parallel",),
                vmem_limit_bytes=VMEM_LIMIT),
        )(x, w, b)
    # Small matmul: single block in VMEM.
    return pl.pallas_call(
        kernel,
        out_shape=jax.ShapeDtypeStruct((M, N), F32),
        in_specs=[pl.BlockSpec(memory_space=pltpu.MemorySpace.VMEM)] * 3,
        out_specs=pl.BlockSpec(memory_space=pltpu.MemorySpace.VMEM),
        compiler_params=pltpu.CompilerParams(vmem_limit_bytes=VMEM_LIMIT),
    )(x, w, b)


# --------------------------------------------------------------------------
# LSTM branch: rep-transform + hoisted input projection + recurrence + head,
# all fused in one gridless kernel (single DMA of the tiny operands).
# --------------------------------------------------------------------------
def _lstm_branch_kernel(len_ref, repin_ref, wrep_ref, brep_ref, wih_ref,
                        whh_ref, b_ref, h0_ref, c0_ref, wcls_ref, bcls_ref,
                        o_ref, *, T):
    B, E = h0_ref.shape

    # representation transformation + ReLU: (T*B, 2E) @ (2E, E)
    rep = jnp.dot(repin_ref[...], wrep_ref[...],
                  preferred_element_type=jnp.float32) + brep_ref[...]
    rep = jnp.maximum(rep, 0.0)

    # hoisted input projection: one (T*B, E) @ (E, 4E) matmul for all steps
    gx = jnp.dot(rep, wih_ref[...],
                 preferred_element_type=jnp.float32) + b_ref[...]     # (T*B, 4E)

    whh = whh_ref[...]
    lens = len_ref[...]                                               # (B, 1) int32
    h = h0_ref[...]
    c = c0_ref[...]

    for t in range(T):                                                # static unroll (T small)
        g = gx[t * B:(t + 1) * B, :] + jnp.dot(
            h, whh, preferred_element_type=jnp.float32)               # (B, 4E)
        i = jax.nn.sigmoid(g[:, 0 * E:1 * E])
        f = jax.nn.sigmoid(g[:, 1 * E:2 * E])
        gg = jnp.tanh(g[:, 2 * E:3 * E])
        o = jax.nn.sigmoid(g[:, 3 * E:4 * E])
        c_new = f * c + i * gg
        h_new = o * jnp.tanh(c_new)
        # pack_padded_sequence semantics: freeze state once t >= lengths[b]
        valid = lens > t                                              # (B, 1) bool
        c = jnp.where(valid, c_new, c)
        h = jnp.where(valid, h_new, h)

    # classifier head fused as epilogue: (B, E) @ (E, 3), acting on cn[-1]
    o_ref[...] = jnp.dot(c, wcls_ref[...],
                         preferred_element_type=jnp.float32) + bcls_ref[...]


def lstm_sequence_forward(p, sequences, lengths, users):
    """sequences:(T,B) int, lengths:(B,), users:(1,B) int  -> (B,3)."""
    T, B = sequences.shape
    E = p['embSize']
    embeds = jnp.take(p['embed'], sequences, axis=0)                  # (T, B, E)
    user_emb = jnp.take(p['user_embed'], users, axis=0)               # (1, B, E)
    user_exp = jnp.broadcast_to(user_emb, embeds.shape)               # (T, B, E)
    rep_in = jnp.concatenate([embeds, user_exp], axis=2)              # (T, B, 2E)
    rep_in = rep_in.reshape(T * B, 2 * E).astype(F32)
    len2d = lengths.reshape(B, 1).astype(jnp.int32)
    h0 = user_emb[0].astype(F32)
    c0 = user_emb[0].astype(F32)
    return pl.pallas_call(
        functools.partial(_lstm_branch_kernel, T=T),
        out_shape=jax.ShapeDtypeStruct((B, 3), F32),
        in_specs=[pl.BlockSpec(memory_space=pltpu.MemorySpace.VMEM)] * 11,
        out_specs=pl.BlockSpec(memory_space=pltpu.MemorySpace.VMEM),
        compiler_params=pltpu.CompilerParams(vmem_limit_bytes=VMEM_LIMIT),
    )(len2d, rep_in, p['w_rep'], p['b_rep'], p['w_ih_t'], p['w_hh_t'],
      p['b_lstm'], h0, c0, p['w_cls'], p['b_cls'])


# --------------------------------------------------------------------------
# Transformer encoder layer (post-norm, ReLU), grid over batch
# --------------------------------------------------------------------------
def _layernorm(x, gamma, beta, eps=1e-5):
    mu = jnp.mean(x, axis=-1, keepdims=True)
    var = jnp.mean((x - mu) ** 2, axis=-1, keepdims=True)
    return (x - mu) * jax.lax.rsqrt(var + eps) * gamma + beta


def _encoder_layer_kernel(x_ref, nmask_ref, wqkv_ref, bqkv_ref, wo_ref, bo_ref,
                          w1_ref, b1_ref, w2_ref, b2_ref,
                          g1_ref, be1_ref, g2_ref, be2_ref, o_ref, *, num_heads):
    x = x_ref[0]                                                      # (S, D) f32
    S, D = x.shape
    H = num_heads
    Hd = D // H

    xb = x.astype(BF16)
    qkv = jnp.dot(xb, wqkv_ref[...],
                  preferred_element_type=jnp.float32) + bqkv_ref[...]  # (S, 3D)
    q = jnp.transpose(qkv[:, 0 * D:1 * D].reshape(S, H, Hd), (1, 0, 2)).astype(BF16)
    k = jnp.transpose(qkv[:, 1 * D:2 * D].reshape(S, H, Hd), (1, 0, 2)).astype(BF16)
    v = jnp.transpose(qkv[:, 2 * D:3 * D].reshape(S, H, Hd), (1, 0, 2)).astype(BF16)

    scale = 1.0 / (float(Hd) ** 0.5)
    # batched over heads: (H,S,Hd) x (H,S,Hd) -> (H,S,S)
    sc = jnp.einsum('hqd,hkd->hqk', q, k,
                    preferred_element_type=jnp.float32) * scale
    sc = sc + nmask_ref[...]                                          # (1,1,S) additive mask
    sc = sc - jnp.max(sc, axis=-1, keepdims=True)
    p = jnp.exp(sc)
    p = p * pl.reciprocal(jnp.sum(p, axis=-1, keepdims=True), approx=True)
    ctx = jnp.einsum('hqk,hkd->hqd', p.astype(BF16), v,
                     preferred_element_type=jnp.float32)              # (H,S,Hd)
    ctx = jnp.transpose(ctx, (1, 0, 2)).reshape(S, D)

    attn = jnp.dot(ctx.astype(BF16), wo_ref[...],
                   preferred_element_type=jnp.float32) + bo_ref[...]
    y = _layernorm(x + attn, g1_ref[...], be1_ref[...])               # post-norm

    ff = jnp.dot(y.astype(BF16), w1_ref[...],
                 preferred_element_type=jnp.float32) + b1_ref[...]
    ff = jnp.maximum(ff, 0.0)
    ff = jnp.dot(ff.astype(BF16), w2_ref[...],
                 preferred_element_type=jnp.float32) + b2_ref[...]
    y = _layernorm(y + ff, g2_ref[...], be2_ref[...])

    o_ref[0] = y


def transformer_encoder_layer(x, neg_mask, lp, num_heads):
    B, S, D = x.shape
    Dff = lp['w1'].shape[1]
    args = (x.astype(F32), neg_mask,
            lp['wqkv'], lp['bqkv'], lp['wo'], lp['bo'],
            lp['w1'], lp['b1'], lp['w2'], lp['b2'],
            lp['ln1_g'], lp['ln1_b'], lp['ln2_g'], lp['ln2_b'])
    in_specs = [
        pl.BlockSpec((1, S, D), lambda b: (b, 0, 0)),       # x (per batch)
        pl.BlockSpec((1, 1, S), lambda b: (b, 0, 0)),       # additive mask
        pl.BlockSpec((D, 3 * D), lambda b: (0, 0)),         # wqkv (bf16)
        pl.BlockSpec((1, 3 * D), lambda b: (0, 0)),         # bqkv
        pl.BlockSpec((D, D), lambda b: (0, 0)),             # wo (bf16)
        pl.BlockSpec((1, D), lambda b: (0, 0)),             # bo
        pl.BlockSpec((D, Dff), lambda b: (0, 0)),           # w1 (bf16, padded)
        pl.BlockSpec((1, Dff), lambda b: (0, 0)),           # b1
        pl.BlockSpec((Dff, D), lambda b: (0, 0)),           # w2 (bf16, padded)
        pl.BlockSpec((1, D), lambda b: (0, 0)),             # b2
        pl.BlockSpec((1, D), lambda b: (0, 0)),             # ln1_g
        pl.BlockSpec((1, D), lambda b: (0, 0)),             # ln1_b
        pl.BlockSpec((1, D), lambda b: (0, 0)),             # ln2_g
        pl.BlockSpec((1, D), lambda b: (0, 0)),             # ln2_b
    ]
    return pl.pallas_call(
        functools.partial(_encoder_layer_kernel, num_heads=num_heads),
        out_shape=jax.ShapeDtypeStruct((B, S, D), F32),
        grid_spec=pltpu.PrefetchScalarGridSpec(
            num_scalar_prefetch=0, grid=(B,),
            in_specs=in_specs,
            out_specs=pl.BlockSpec((1, S, D), lambda b: (b, 0, 0))),
        compiler_params=pltpu.CompilerParams(
            dimension_semantics=("parallel",),
            vmem_limit_bytes=VMEM_LIMIT),
    )(*args)


# --------------------------------------------------------------------------
# Model forward (glue in plain JAX, hot paths in Pallas)
# --------------------------------------------------------------------------
def transformer_forward(p, img_features, img_mask, word_features, bert_mask,
                        user_ids, userembed=True):
    B, Simg, Fimg = img_features.shape
    D = word_features.shape[-1]
    down = linear(img_features.reshape(B * Simg, Fimg),
                  p['w_down'], p['b_down'], relu=True, block_n=256)
    down = down.reshape(B, Simg, D)
    mm_input = jnp.concatenate([word_features.astype(F32), down], axis=1)   # (B,S,D)
    enc_mask = jnp.concatenate([bert_mask, img_mask], axis=1).astype(F32)   # (B,S) 1=pad
    neg_mask = (enc_mask * (-1e9)).reshape(B, 1, -1)                        # additive
    y = mm_input
    for lp in p['layers']:
        y = transformer_encoder_layer(y, neg_mask, lp, p['num_heads'])
    cls = y[:, 0]                                                     # (B, D)
    if userembed:
        usr = jnp.take(p['usr_emb'], user_ids.reshape(-1), axis=0)    # (B, 16)
    else:
        usr = jnp.zeros((B, 16), F32)
    combined = jnp.concatenate([cls, usr], axis=1)                    # (B, D+16)
    # Tiny head (out dim 3): plain jnp (a Pallas call would be pure launch/store overhead).
    return jnp.dot(combined, p['w_sec'],
                   preferred_element_type=F32) + p['b_sec']           # (B, 3)


def ensemble_forward(params, seq_ins, feat_ins, f=True):
    sequences, lengths, users = seq_ins
    m1 = lstm_sequence_forward(params['seq'], sequences, lengths, users)
    m2 = transformer_forward(params['feat'], *feat_ins,
                             userembed=params['userembed'])
    if f:
        return (m1 + m2) / 2.0
    combined = jnp.concatenate([m1, m2], axis=1)
    return jnp.dot(combined, params['w_final'],
                   preferred_element_type=F32) + params['b_final']


# --------------------------------------------------------------------------
# Deterministic parameter init (xavier-uniform-like)
# --------------------------------------------------------------------------
def xavier(key, shape, fan_in, fan_out):
    a = (6.0 / (fan_in + fan_out)) ** 0.5
    return jax.random.uniform(key, shape, minval=-a, maxval=a, dtype=F32)


def build_params(key, emb_size=32, num_heads=6, num_layers=1, ff_dim=64):
    D, IMG_F, USR_D = 768, 2048, 16
    ks = iter(jax.random.split(key, 64))
    # item embedding: padding_idx=0 -> row 0 is zeros (nn.Embedding parity)
    item_embed = xavier(next(ks), (837, emb_size), 837, emb_size).at[0].set(0.0)
    seq = dict(
        embSize=emb_size,
        embed=item_embed,
        user_embed=xavier(next(ks), (107, emb_size), 107, emb_size),
        w_rep=xavier(next(ks), (2 * emb_size, emb_size), 2 * emb_size, emb_size),
        b_rep=jnp.zeros((1, emb_size), F32),
        w_ih_t=xavier(next(ks), (emb_size, 4 * emb_size), emb_size, 4 * emb_size),
        w_hh_t=xavier(next(ks), (emb_size, 4 * emb_size), emb_size, 4 * emb_size),
        b_lstm=0.01 * jax.random.normal(next(ks), (1, 4 * emb_size), F32),
        w_cls=xavier(next(ks), (emb_size, 3), emb_size, 3),
        b_cls=jnp.zeros((1, 3), F32),
    )
    # FFN hidden dim zero-padded to a multiple of 128 lanes (numerically identical).
    ff_pad = ((ff_dim + 127) // 128) * 128
    layers = []
    for _ in range(num_layers):
        w1 = xavier(next(ks), (D, ff_dim), D, ff_dim)
        w1 = jnp.pad(w1, ((0, 0), (0, ff_pad - ff_dim)))
        w2 = xavier(next(ks), (ff_dim, D), ff_dim, D)
        w2 = jnp.pad(w2, ((0, ff_pad - ff_dim), (0, 0)))
        layers.append(dict(
            wqkv=xavier(next(ks), (D, 3 * D), D, 3 * D).astype(BF16),
            bqkv=jnp.zeros((1, 3 * D), F32),
            wo=xavier(next(ks), (D, D), D, D).astype(BF16),
            bo=jnp.zeros((1, D), F32),
            w1=w1.astype(BF16),
            b1=jnp.zeros((1, ff_pad), F32),
            w2=w2.astype(BF16),
            b2=jnp.zeros((1, D), F32),
            ln1_g=jnp.ones((1, D), F32), ln1_b=jnp.zeros((1, D), F32),
            ln2_g=jnp.ones((1, D), F32), ln2_b=jnp.zeros((1, D), F32),
        ))
    feat = dict(
        num_heads=num_heads,
        w_down=xavier(next(ks), (IMG_F, D), IMG_F, D).astype(BF16),
        b_down=jnp.zeros((1, D), F32),
        usr_emb=xavier(next(ks), (106, USR_D), 106, USR_D),
        w_sec=xavier(next(ks), (D + USR_D, 3), D + USR_D, 3),
        b_sec=jnp.zeros((1, 3), F32),
        layers=layers,
    )
    return dict(
        seq=seq, feat=feat, userembed=True,
        w_final=xavier(next(ks), (6, 3), 6, 3),
        b_final=jnp.zeros((1, 3), F32),
    )


# --------------------------------------------------------------------------
# Example run
# --------------------------------------------------------------------------
if __name__ == "__main__":
    key = jax.random.PRNGKey(0)
    k_par, k_seq, k_usr, k_img, k_wrd, k_uid = jax.random.split(key, 6)

    B, T, EMB = 2, 8, 32
    SWORD, SIMG, D, IMG_F = 8, 8, 768, 2048

    params = build_params(k_par, emb_size=EMB, num_heads=6, num_layers=1, ff_dim=64)

    # --- LSTM-branch inputs (time-major, like nn.LSTM default) ---
    sequences = jax.random.randint(k_seq, (T, B), 0, 837, dtype=jnp.int32)
    lengths = jnp.array([8, 5], dtype=jnp.int32)
    users = jax.random.randint(k_usr, (1, B), 0, 107, dtype=jnp.int32)
    seq_ins = (sequences, lengths, users)

    # --- Transformer-branch inputs (batch-first) ---
    img_features = jax.random.normal(k_img, (B, SIMG, IMG_F), F32)
    img_mask = jnp.zeros((B, SIMG), F32).at[1, SIMG - 2:].set(1.0)    # 1.0 = pad
    # TODO(synk): word_features stands in for the frozen BERT last hidden state.
    word_features = jax.random.normal(k_wrd, (B, SWORD, D), F32)
    bert_mask = jnp.zeros((B, SWORD), F32)                            # all valid
    user_ids = jax.random.randint(k_uid, (B, 1), 0, 106, dtype=jnp.int32)
    feat_ins = (img_features, img_mask, word_features, bert_mask, user_ids)

    out = ensemble_forward(params, seq_ins, feat_ins, f=True)
    out = jax.block_until_ready(out)
    assert out.shape == (B, 3) and out.dtype == jnp.float32
    print("KERNEL_OK")
</pallas_src>

<mosaic_0001>
module attributes {stable_mosaic.version = 11 : i64} {
  func.func @_lstm_branch_kernel(%arg0: memref<2x1xi32, #tpu.memory_space<vmem>>, %arg1: memref<16x64xf32, #tpu.memory_space<vmem>>, %arg2: memref<64x32xf32, #tpu.memory_space<vmem>>, %arg3: memref<1x32xf32, #tpu.memory_space<vmem>>, %arg4: memref<32x128xf32, #tpu.memory_space<vmem>>, %arg5: memref<32x128xf32, #tpu.memory_space<vmem>>, %arg6: memref<1x128xf32, #tpu.memory_space<vmem>>, %arg7: memref<2x32xf32, #tpu.memory_space<vmem>>, %arg8: memref<2x32xf32, #tpu.memory_space<vmem>>, %arg9: memref<32x3xf32, #tpu.memory_space<vmem>>, %arg10: memref<1x3xf32, #tpu.memory_space<vmem>>, %arg11: memref<2x3xf32, #tpu.memory_space<vmem>>) attributes {dimension_semantics = [], scalar_prefetch = 0 : i64, scratch_operands = 0 : i64, tpu.core_type = #tpu.core_type<tc>} {
    %c0 = arith.constant 0 : index
    %c0_0 = arith.constant 0 : index
    %0 = vector.load %arg1[%c0, %c0_0] : memref<16x64xf32, #tpu.memory_space<vmem>>, vector<16x64xf32>
    %c0_1 = arith.constant 0 : index
    %c0_2 = arith.constant 0 : index
    %1 = vector.load %arg2[%c0_1, %c0_2] : memref<64x32xf32, #tpu.memory_space<vmem>>, vector<64x32xf32>
    %cst = arith.constant dense<0.000000e+00> : vector<16x32xf32>
    %2 = tpu.matmul %0, %1, %cst {dimension_numbers = #tpu.dot_dimension_numbers<[1], [0], [0], [1], [0, 0, 1, 1], [], []>} : vector<16x64xf32>, vector<64x32xf32>, vector<16x32xf32> -> vector<16x32xf32>
    %c0_3 = arith.constant 0 : index
    %c0_4 = arith.constant 0 : index
    %3 = vector.load %arg3[%c0_3, %c0_4] : memref<1x32xf32, #tpu.memory_space<vmem>>, vector<1x32xf32>
    %4 = vector.broadcast %3 : vector<1x32xf32> to vector<16x32xf32>
    %5 = arith.addf %2, %4 : vector<16x32xf32>
    %cst_5 = arith.constant 0.000000e+00 : f32
    %6 = vector.broadcast %cst_5 : f32 to vector<16x32xf32>
    %7 = arith.maximumf %5, %6 : vector<16x32xf32>
    %c0_6 = arith.constant 0 : index
    %c0_7 = arith.constant 0 : index
    %8 = vector.load %arg4[%c0_6, %c0_7] : memref<32x128xf32, #tpu.memory_space<vmem>>, vector<32x128xf32>
    %cst_8 = arith.constant dense<0.000000e+00> : vector<16x128xf32>
    %9 = tpu.matmul %7, %8, %cst_8 {dimension_numbers = #tpu.dot_dimension_numbers<[1], [0], [0], [1], [0, 0, 1, 1], [], []>} : vector<16x32xf32>, vector<32x128xf32>, vector<16x128xf32> -> vector<16x128xf32>
    %c0_9 = arith.constant 0 : index
    %c0_10 = arith.constant 0 : index
    %10 = vector.load %arg6[%c0_9, %c0_10] : memref<1x128xf32, #tpu.memory_space<vmem>>, vector<1x128xf32>
    %11 = vector.broadcast %10 : vector<1x128xf32> to vector<16x128xf32>
    %12 = arith.addf %9, %11 : vector<16x128xf32>
    %c0_11 = arith.constant 0 : index
    %c0_12 = arith.constant 0 : index
    %13 = vector.load %arg5[%c0_11, %c0_12] : memref<32x128xf32, #tpu.memory_space<vmem>>, vector<32x128xf32>
    %c0_13 = arith.constant 0 : index
    %c0_14 = arith.constant 0 : index
    %14 = vector.load %arg0[%c0_13, %c0_14] : memref<2x1xi32, #tpu.memory_space<vmem>>, vector<2x1xi32>
    %c0_15 = arith.constant 0 : index
    %c0_16 = arith.constant 0 : index
    %15 = vector.load %arg7[%c0_15, %c0_16] : memref<2x32xf32, #tpu.memory_space<vmem>>, vector<2x32xf32>
    %c0_17 = arith.constant 0 : index
    %c0_18 = arith.constant 0 : index
    %16 = vector.load %arg8[%c0_17, %c0_18] : memref<2x32xf32, #tpu.memory_space<vmem>>, vector<2x32xf32>
    %17 = vector.extract_strided_slice %12 {offsets = [0, 0], sizes = [2, 128], strides = [1, 1]} : vector<16x128xf32> to vector<2x128xf32>
    %cst_19 = arith.constant dense<0.000000e+00> : vector<2x128xf32>
    %18 = tpu.matmul %15, %13, %cst_19 {dimension_numbers = #tpu.dot_dimension_numbers<[1], [0], [0], [1], [0, 0, 1, 1], [], []>} : vector<2x32xf32>, vector<32x128xf32>, vector<2x128xf32> -> vector<2x128xf32>
    %19 = arith.addf %17, %18 : vector<2x128xf32>
    %20 = vector.extract_strided_slice %19 {offsets = [0, 0], sizes = [2, 32], strides = [1, 1]} : vector<2x128xf32> to vector<2x32xf32>
    %21 = arith.negf %20 : vector<2x32xf32>
    %22 = math.exp %21 : vector<2x32xf32>
    %cst_20 = arith.constant 1.000000e+00 : f32
    %23 = vector.broadcast %cst_20 : f32 to vector<2x32xf32>
    %24 = arith.addf %23, %22 : vector<2x32xf32>
    %25 = arith.divf %23, %24 : vector<2x32xf32>
    %26 = vector.extract_strided_slice %19 {offsets = [0, 32], sizes = [2, 32], strides = [1, 1]} : vector<2x128xf32> to vector<2x32xf32>
    %27 = arith.negf %26 : vector<2x32xf32>
    %28 = math.exp %27 : vector<2x32xf32>
    %cst_21 = arith.constant 1.000000e+00 : f32
    %29 = vector.broadcast %cst_21 : f32 to vector<2x32xf32>
    %30 = arith.addf %29, %28 : vector<2x32xf32>
    %31 = arith.divf %29, %30 : vector<2x32xf32>
    %32 = vector.extract_strided_slice %19 {offsets = [0, 64], sizes = [2, 32], strides = [1, 1]} : vector<2x128xf32> to vector<2x32xf32>
    %33 = math.tanh %32 : vector<2x32xf32>
    %34 = vector.extract_strided_slice %19 {offsets = [0, 96], sizes = [2, 32], strides = [1, 1]} : vector<2x128xf32> to vector<2x32xf32>
    %35 = arith.negf %34 : vector<2x32xf32>
    %36 = math.exp %35 : vector<2x32xf32>
    %cst_22 = arith.constant 1.000000e+00 : f32
    %37 = vector.broadcast %cst_22 : f32 to vector<2x32xf32>
    %38 = arith.addf %37, %36 : vector<2x32xf32>
    %39 = arith.divf %37, %38 : vector<2x32xf32>
    %40 = arith.mulf %31, %16 : vector<2x32xf32>
    %41 = arith.mulf %25, %33 : vector<2x32xf32>
    %42 = arith.addf %40, %41 : vector<2x32xf32>
    %43 = math.tanh %42 : vector<2x32xf32>
    %44 = arith.mulf %39, %43 : vector<2x32xf32>
    %c0_i32 = arith.constant 0 : i32
    %45 = vector.broadcast %c0_i32 : i32 to vector<2x1xi32>
    %46 = arith.cmpi sgt, %14, %45 : vector<2x1xi32>
    %47 = vector.shape_cast %46 : vector<2x1xi1> to vector<2x1xi1>
    %48 = vector.broadcast %47 : vector<2x1xi1> to vector<2x32xi1>
    %49 = arith.select %48, %42, %16 : vector<2x32xi1>, vector<2x32xf32>
    %50 = vector.shape_cast %46 : vector<2x1xi1> to vector<2x1xi1>
    %51 = vector.broadcast %50 : vector<2x1xi1> to vector<2x32xi1>
    %52 = arith.select %51, %44, %15 : vector<2x32xi1>, vector<2x32xf32>
    %53 = vector.extract_strided_slice %12 {offsets = [2, 0], sizes = [2, 128], strides = [1, 1]} : vector<16x128xf32> to vector<2x128xf32>
    %cst_23 = arith.constant dense<0.000000e+00> : vector<2x128xf32>
    %54 = tpu.matmul %52, %13, %cst_23 {dimension_numbers = #tpu.dot_dimension_numbers<[1], [0], [0], [1], [0, 0, 1, 1], [], []>} : vector<2x32xf32>, vector<32x128xf32>, vector<2x128xf32> -> vector<2x128xf32>
    %55 = arith.addf %53, %54 : vector<2x128xf32>
    %56 = vector.extract_strided_slice %55 {offsets = [0, 0], sizes = [2, 32], strides = [1, 1]} : vector<2x128xf32> to vector<2x32xf32>
    %57 = arith.negf %56 : vector<2x32xf32>
    %58 = math.exp %57 : vector<2x32xf32>
    %cst_24 = arith.constant 1.000000e+00 : f32
    %59 = vector.broadcast %cst_24 : f32 to vector<2x32xf32>
    %60 = arith.addf %59, %58 : vector<2x32xf32>
    %61 = arith.divf %59, %60 : vector<2x32xf32>
    %62 = vector.extract_strided_slice %55 {offsets = [0, 32], sizes = [2, 32], strides = [1, 1]} : vector<2x128xf32> to vector<2x32xf32>
    %63 = arith.negf %62 : vector<2x32xf32>
    %64 = math.exp %63 : vector<2x32xf32>
    %cst_25 = arith.constant 1.000000e+00 : f32
    %65 = vector.broadcast %cst_25 : f32 to vector<2x32xf32>
    %66 = arith.addf %65, %64 : vector<2x32xf32>
    %67 = arith.divf %65, %66 : vector<2x32xf32>
    %68 = vector.extract_strided_slice %55 {offsets = [0, 64], sizes = [2, 32], strides = [1, 1]} : vector<2x128xf32> to vector<2x32xf32>
    %69 = math.tanh %68 : vector<2x32xf32>
    %70 = vector.extract_strided_slice %55 {offsets = [0, 96], sizes = [2, 32], strides = [1, 1]} : vector<2x128xf32> to vector<2x32xf32>
    %71 = arith.negf %70 : vector<2x32xf32>
    %72 = math.exp %71 : vector<2x32xf32>
    %cst_26 = arith.constant 1.000000e+00 : f32
    %73 = vector.broadcast %cst_26 : f32 to vector<2x32xf32>
    %74 = arith.addf %73, %72 : vector<2x32xf32>
    %75 = arith.divf %73, %74 : vector<2x32xf32>
    %76 = arith.mulf %67, %49 : vector<2x32xf32>
    %77 = arith.mulf %61, %69 : vector<2x32xf32>
    %78 = arith.addf %76, %77 : vector<2x32xf32>
    %79 = math.tanh %78 : vector<2x32xf32>
    %80 = arith.mulf %75, %79 : vector<2x32xf32>
    %c1_i32 = arith.constant 1 : i32
    %81 = vector.broadcast %c1_i32 : i32 to vector<2x1xi32>
    %82 = arith.cmpi sgt, %14, %81 : vector<2x1xi32>
    %83 = vector.shape_cast %82 : vector<2x1xi1> to vector<2x1xi1>
    %84 = vector.broadcast %83 : vector<2x1xi1> to vector<2x32xi1>
    %85 = arith.select %84, %78, %49 : vector<2x32xi1>, vector<2x32xf32>
    %86 = vector.shape_cast %82 : vector<2x1xi1> to vector<2x1xi1>
    %87 = vector.broadcast %86 : vector<2x1xi1> to vector<2x32xi1>
    %88 = arith.select %87, %80, %52 : vector<2x32xi1>, vector<2x32xf32>
    %89 = vector.extract_strided_slice %12 {offsets = [4, 0], sizes = [2, 128], strides = [1, 1]} : vector<16x128xf32> to vector<2x128xf32>
    %cst_27 = arith.constant dense<0.000000e+00> : vector<2x128xf32>
    %90 = tpu.matmul %88, %13, %cst_27 {dimension_numbers = #tpu.dot_dimension_numbers<[1], [0], [0], [1], [0, 0, 1, 1], [], []>} : vector<2x32xf32>, vector<32x128xf32>, vector<2x128xf32> -> vector<2x128xf32>
    %91 = arith.addf %89, %90 : vector<2x128xf32>
    %92 = vector.extract_strided_slice %91 {offsets = [0, 0], sizes = [2, 32], strides = [1, 1]} : vector<2x128xf32> to vector<2x32xf32>
    %93 = arith.negf %92 : vector<2x32xf32>
    %94 = math.exp %93 : vector<2x32xf32>
    %cst_28 = arith.constant 1.000000e+00 : f32
    %95 = vector.broadcast %cst_28 : f32 to vector<2x32xf32>
    %96 = arith.addf %95, %94 : vector<2x32xf32>
    %97 = arith.divf %95, %96 : vector<2x32xf32>
    %98 = vector.extract_strided_slice %91 {offsets = [0, 32], sizes = [2, 32], strides = [1, 1]} : vector<2x128xf32> to vector<2x32xf32>
    %99 = arith.negf %98 : vector<2x32xf32>
    %100 = math.exp %99 : vector<2x32xf32>
    %cst_29 = arith.constant 1.000000e+00 : f32
    %101 = vector.broadcast %cst_29 : f32 to vector<2x32xf32>
    %102 = arith.addf %101, %100 : vector<2x32xf32>
    %103 = arith.divf %101, %102 : vector<2x32xf32>
    %104 = vector.extract_strided_slice %91 {offsets = [0, 64], sizes = [2, 32], strides = [1, 1]} : vector<2x128xf32> to vector<2x32xf32>
    %105 = math.tanh %104 : vector<2x32xf32>
    %106 = vector.extract_strided_slice %91 {offsets = [0, 96], sizes = [2, 32], strides = [1, 1]} : vector<2x128xf32> to vector<2x32xf32>
    %107 = arith.negf %106 : vector<2x32xf32>
    %108 = math.exp %107 : vector<2x32xf32>
    %cst_30 = arith.constant 1.000000e+00 : f32
    %109 = vector.broadcast %cst_30 : f32 to vector<2x32xf32>
    %110 = arith.addf %109, %108 : vector<2x32xf32>
    %111 = arith.divf %109, %110 : vector<2x32xf32>
    %112 = arith.mulf %103, %85 : vector<2x32xf32>
    %113 = arith.mulf %97, %105 : vector<2x32xf32>
    %114 = arith.addf %112, %113 : vector<2x32xf32>
    %115 = math.tanh %114 : vector<2x32xf32>
    %116 = arith.mulf %111, %115 : vector<2x32xf32>
    %c2_i32 = arith.constant 2 : i32
    %117 = vector.broadcast %c2_i32 : i32 to vector<2x1xi32>
    %118 = arith.cmpi sgt, %14, %117 : vector<2x1xi32>
    %119 = vector.shape_cast %118 : vector<2x1xi1> to vector<2x1xi1>
    %120 = vector.broadcast %119 : vector<2x1xi1> to vector<2x32xi1>
    %121 = arith.select %120, %114, %85 : vector<2x32xi1>, vector<2x32xf32>
    %122 = vector.shape_cast %118 : vector<2x1xi1> to vector<2x1xi1>
    %123 = vector.broadcast %122 : vector<2x1xi1> to vector<2x32xi1>
    %124 = arith.select %123, %116, %88 : vector<2x32xi1>, vector<2x32xf32>
    %125 = vector.extract_strided_slice %12 {offsets = [6, 0], sizes = [2, 128], strides = [1, 1]} : vector<16x128xf32> to vector<2x128xf32>
    %cst_31 = arith.constant dense<0.000000e+00> : vector<2x128xf32>
    %126 = tpu.matmul %124, %13, %cst_31 {dimension_numbers = #tpu.dot_dimension_numbers<[1], [0], [0], [1], [0, 0, 1, 1], [], []>} : vector<2x32xf32>, vector<32x128xf32>, vector<2x128xf32> -> vector<2x128xf32>
    %127 = arith.addf %125, %126 : vector<2x128xf32>
    %128 = vector.extract_strided_slice %127 {offsets = [0, 0], sizes = [2, 32], strides = [1, 1]} : vector<2x128xf32> to vector<2x32xf32>
    %129 = arith.negf %128 : vector<2x32xf32>
    %130 = math.exp %129 : vector<2x32xf32>
    %cst_32 = arith.constant 1.000000e+00 : f32
    %131 = vector.broadcast %cst_32 : f32 to vector<2x32xf32>
    %132 = arith.addf %131, %130 : vector<2x32xf32>
    %133 = arith.divf %131, %132 : vector<2x32xf32>
    %134 = vector.extract_strided_slice %127 {offsets = [0, 32], sizes = [2, 32], strides = [1, 1]} : vector<2x128xf32> to vector<2x32xf32>
    %135 = arith.negf %134 : vector<2x32xf32>
    %136 = math.exp %135 : vector<2x32xf32>
    %cst_33 = arith.constant 1.000000e+00 : f32
    %137 = vector.broadcast %cst_33 : f32 to vector<2x32xf32>
    %138 = arith.addf %137, %136 : vector<2x32xf32>
    %139 = arith.divf %137, %138 : vector<2x32xf32>
    %140 = vector.extract_strided_slice %127 {offsets = [0, 64], sizes = [2, 32], strides = [1, 1]} : vector<2x128xf32> to vector<2x32xf32>
    %141 = math.tanh %140 : vector<2x32xf32>
    %142 = vector.extract_strided_slice %127 {offsets = [0, 96], sizes = [2, 32], strides = [1, 1]} : vector<2x128xf32> to vector<2x32xf32>
    %143 = arith.negf %142 : vector<2x32xf32>
    %144 = math.exp %143 : vector<2x32xf32>
    %cst_34 = arith.constant 1.000000e+00 : f32
    %145 = vector.broadcast %cst_34 : f32 to vector<2x32xf32>
    %146 = arith.addf %145, %144 : vector<2x32xf32>
    %147 = arith.divf %145, %146 : vector<2x32xf32>
    %148 = arith.mulf %139, %121 : vector<2x32xf32>
    %149 = arith.mulf %133, %141 : vector<2x32xf32>
    %150 = arith.addf %148, %149 : vector<2x32xf32>
    %151 = math.tanh %150 : vector<2x32xf32>
    %152 = arith.mulf %147, %151 : vector<2x32xf32>
    %c3_i32 = arith.constant 3 : i32
    %153 = vector.broadcast %c3_i32 : i32 to vector<2x1xi32>
    %154 = arith.cmpi sgt, %14, %153 : vector<2x1xi32>
    %155 = vector.shape_cast %154 : vector<2x1xi1> to vector<2x1xi1>
    %156 = vector.broadcast %155 : vector<2x1xi1> to vector<2x32xi1>
    %157 = arith.select %156, %150, %121 : vector<2x32xi1>, vector<2x32xf32>
    %158 = vector.shape_cast %154 : vector<2x1xi1> to vector<2x1xi1>
    %159 = vector.broadcast %158 : vector<2x1xi1> to vector<2x32xi1>
    %160 = arith.select %159, %152, %124 : vector<2x32xi1>, vector<2x32xf32>
    %161 = vector.extract_strided_slice %12 {offsets = [8, 0], sizes = [2, 128], strides = [1, 1]} : vector<16x128xf32> to vector<2x128xf32>
    %cst_35 = arith.constant dense<0.000000e+00> : vector<2x128xf32>
    %162 = tpu.matmul %160, %13, %cst_35 {dimension_numbers = #tpu.dot_dimension_numbers<[1], [0], [0], [1], [0, 0, 1, 1], [], []>} : vector<2x32xf32>, vector<32x128xf32>, vector<2x128xf32> -> vector<2x128xf32>
    %163 = arith.addf %161, %162 : vector<2x128xf32>
    %164 = vector.extract_strided_slice %163 {offsets = [0, 0], sizes = [2, 32], strides = [1, 1]} : vector<2x128xf32> to vector<2x32xf32>
    %165 = arith.negf %164 : vector<2x32xf32>
    %166 = math.exp %165 : vector<2x32xf32>
    %cst_36 = arith.constant 1.000000e+00 : f32
    %167 = vector.broadcast %cst_36 : f32 to vector<2x32xf32>
    %168 = arith.addf %167, %166 : vector<2x32xf32>
    %169 = arith.divf %167, %168 : vector<2x32xf32>
    %170 = vector.extract_strided_slice %163 {offsets = [0, 32], sizes = [2, 32], strides = [1, 1]} : vector<2x128xf32> to vector<2x32xf32>
    %171 = arith.negf %170 : vector<2x32xf32>
    %172 = math.exp %171 : vector<2x32xf32>
    %cst_37 = arith.constant 1.000000e+00 : f32
    %173 = vector.broadcast %cst_37 : f32 to vector<2x32xf32>
    %174 = arith.addf %173, %172 : vector<2x32xf32>
    %175 = arith.divf %173, %174 : vector<2x32xf32>
    %176 = vector.extract_strided_slice %163 {offsets = [0, 64], sizes = [2, 32], strides = [1, 1]} : vector<2x128xf32> to vector<2x32xf32>
    %177 = math.tanh %176 : vector<2x32xf32>
    %178 = vector.extract_strided_slice %163 {offsets = [0, 96], sizes = [2, 32], strides = [1, 1]} : vector<2x128xf32> to vector<2x32xf32>
    %179 = arith.negf %178 : vector<2x32xf32>
    %180 = math.exp %179 : vector<2x32xf32>
    %cst_38 = arith.constant 1.000000e+00 : f32
    %181 = vector.broadcast %cst_38 : f32 to vector<2x32xf32>
    %182 = arith.addf %181, %180 : vector<2x32xf32>
    %183 = arith.divf %181, %182 : vector<2x32xf32>
    %184 = arith.mulf %175, %157 : vector<2x32xf32>
    %185 = arith.mulf %169, %177 : vector<2x32xf32>
    %186 = arith.addf %184, %185 : vector<2x32xf32>
    %187 = math.tanh %186 : vector<2x32xf32>
    %188 = arith.mulf %183, %187 : vector<2x32xf32>
    %c4_i32 = arith.constant 4 : i32
    %189 = vector.broadcast %c4_i32 : i32 to vector<2x1xi32>
    %190 = arith.cmpi sgt, %14, %189 : vector<2x1xi32>
    %191 = vector.shape_cast %190 : vector<2x1xi1> to vector<2x1xi1>
    %192 = vector.broadcast %191 : vector<2x1xi1> to vector<2x32xi1>
    %193 = arith.select %192, %186, %157 : vector<2x32xi1>, vector<2x32xf32>
    %194 = vector.shape_cast %190 : vector<2x1xi1> to vector<2x1xi1>
    %195 = vector.broadcast %194 : vector<2x1xi1> to vector<2x32xi1>
    %196 = arith.select %195, %188, %160 : vector<2x32xi1>, vector<2x32xf32>
    %197 = vector.extract_strided_slice %12 {offsets = [10, 0], sizes = [2, 128], strides = [1, 1]} : vector<16x128xf32> to vector<2x128xf32>
    %cst_39 = arith.constant dense<0.000000e+00> : vector<2x128xf32>
    %198 = tpu.matmul %196, %13, %cst_39 {dimension_numbers = #tpu.dot_dimension_numbers<[1], [0], [0], [1], [0, 0, 1, 1], [], []>} : vector<2x32xf32>, vector<32x128xf32>, vector<2x128xf32> -> vector<2x128xf32>
    %199 = arith.addf %197, %198 : vector<2x128xf32>
    %200 = vector.extract_strided_slice %199 {offsets = [0, 0], sizes = [2, 32], strides = [1, 1]} : vector<2x128xf32> to vector<2x32xf32>
    %201 = arith.negf %200 : vector<2x32xf32>
    %202 = math.exp %201 : vector<2x32xf32>
    %cst_40 = arith.constant 1.000000e+00 : f32
    %203 = vector.broadcast %cst_40 : f32 to vector<2x32xf32>
    %204 = arith.addf %203, %202 : vector<2x32xf32>
    %205 = arith.divf %203, %204 : vector<2x32xf32>
    %206 = vector.extract_strided_slice %199 {offsets = [0, 32], sizes = [2, 32], strides = [1, 1]} : vector<2x128xf32> to vector<2x32xf32>
    %207 = arith.negf %206 : vector<2x32xf32>
    %208 = math.exp %207 : vector<2x32xf32>
    %cst_41 = arith.constant 1.000000e+00 : f32
    %209 = vector.broadcast %cst_41 : f32 to vector<2x32xf32>
    %210 = arith.addf %209, %208 : vector<2x32xf32>
    %211 = arith.divf %209, %210 : vector<2x32xf32>
    %212 = vector.extract_strided_slice %199 {offsets = [0, 64], sizes = [2, 32], strides = [1, 1]} : vector<2x128xf32> to vector<2x32xf32>
    %213 = math.tanh %212 : vector<2x32xf32>
    %214 = vector.extract_strided_slice %199 {offsets = [0, 96], sizes = [2, 32], strides = [1, 1]} : vector<2x128xf32> to vector<2x32xf32>
    %215 = arith.negf %214 : vector<2x32xf32>
    %216 = math.exp %215 : vector<2x32xf32>
    %cst_42 = arith.constant 1.000000e+00 : f32
    %217 = vector.broadcast %cst_42 : f32 to vector<2x32xf32>
    %218 = arith.addf %217, %216 : vector<2x32xf32>
    %219 = arith.divf %217, %218 : vector<2x32xf32>
    %220 = arith.mulf %211, %193 : vector<2x32xf32>
    %221 = arith.mulf %205, %213 : vector<2x32xf32>
    %222 = arith.addf %220, %221 : vector<2x32xf32>
    %223 = math.tanh %222 : vector<2x32xf32>
    %224 = arith.mulf %219, %223 : vector<2x32xf32>
    %c5_i32 = arith.constant 5 : i32
    %225 = vector.broadcast %c5_i32 : i32 to vector<2x1xi32>
    %226 = arith.cmpi sgt, %14, %225 : vector<2x1xi32>
    %227 = vector.shape_cast %226 : vector<2x1xi1> to vector<2x1xi1>
    %228 = vector.broadcast %227 : vector<2x1xi1> to vector<2x32xi1>
    %229 = arith.select %228, %222, %193 : vector<2x32xi1>, vector<2x32xf32>
    %230 = vector.shape_cast %226 : vector<2x1xi1> to vector<2x1xi1>
    %231 = vector.broadcast %230 : vector<2x1xi1> to vector<2x32xi1>
    %232 = arith.select %231, %224, %196 : vector<2x32xi1>, vector<2x32xf32>
    %233 = vector.extract_strided_slice %12 {offsets = [12, 0], sizes = [2, 128], strides = [1, 1]} : vector<16x128xf32> to vector<2x128xf32>
    %cst_43 = arith.constant dense<0.000000e+00> : vector<2x128xf32>
    %234 = tpu.matmul %232, %13, %cst_43 {dimension_numbers = #tpu.dot_dimension_numbers<[1], [0], [0], [1], [0, 0, 1, 1], [], []>} : vector<2x32xf32>, vector<32x128xf32>, vector<2x128xf32> -> vector<2x128xf32>
    %235 = arith.addf %233, %234 : vector<2x128xf32>
    %236 = vector.extract_strided_slice %235 {offsets = [0, 0], sizes = [2, 32], strides = [1, 1]} : vector<2x128xf32> to vector<2x32xf32>
    %237 = arith.negf %236 : vector<2x32xf32>
    %238 = math.exp %237 : vector<2x32xf32>
    %cst_44 = arith.constant 1.000000e+00 : f32
    %239 = vector.broadcast %cst_44 : f32 to vector<2x32xf32>
    %240 = arith.addf %239, %238 : vector<2x32xf32>
    %241 = arith.divf %239, %240 : vector<2x32xf32>
    %242 = vector.extract_strided_slice %235 {offsets = [0, 32], sizes = [2, 32], strides = [1, 1]} : vector<2x128xf32> to vector<2x32xf32>
    %243 = arith.negf %242 : vector<2x32xf32>
    %244 = math.exp %243 : vector<2x32xf32>
    %cst_45 = arith.constant 1.000000e+00 : f32
    %245 = vector.broadcast %cst_45 : f32 to vector<2x32xf32>
    %246 = arith.addf %245, %244 : vector<2x32xf32>
    %247 = arith.divf %245, %246 : vector<2x32xf32>
    %248 = vector.extract_strided_slice %235 {offsets = [0, 64], sizes = [2, 32], strides = [1, 1]} : vector<2x128xf32> to vector<2x32xf32>
    %249 = math.tanh %248 : vector<2x32xf32>
    %250 = vector.extract_strided_slice %235 {offsets = [0, 96], sizes = [2, 32], strides = [1, 1]} : vector<2x128xf32> to vector<2x32xf32>
    %251 = arith.negf %250 : vector<2x32xf32>
    %252 = math.exp %251 : vector<2x32xf32>
    %cst_46 = arith.constant 1.000000e+00 : f32
    %253 = vector.broadcast %cst_46 : f32 to vector<2x32xf32>
    %254 = arith.addf %253, %252 : vector<2x32xf32>
    %255 = arith.divf %253, %254 : vector<2x32xf32>
    %256 = arith.mulf %247, %229 : vector<2x32xf32>
    %257 = arith.mulf %241, %249 : vector<2x32xf32>
    %258 = arith.addf %256, %257 : vector<2x32xf32>
    %259 = math.tanh %258 : vector<2x32xf32>
    %260 = arith.mulf %255, %259 : vector<2x32xf32>
    %c6_i32 = arith.constant 6 : i32
    %261 = vector.broadcast %c6_i32 : i32 to vector<2x1xi32>
    %262 = arith.cmpi sgt, %14, %261 : vector<2x1xi32>
    %263 = vector.shape_cast %262 : vector<2x1xi1> to vector<2x1xi1>
    %264 = vector.broadcast %263 : vector<2x1xi1> to vector<2x32xi1>
    %265 = arith.select %264, %258, %229 : vector<2x32xi1>, vector<2x32xf32>
    %266 = vector.shape_cast %262 : vector<2x1xi1> to vector<2x1xi1>
    %267 = vector.broadcast %266 : vector<2x1xi1> to vector<2x32xi1>
    %268 = arith.select %267, %260, %232 : vector<2x32xi1>, vector<2x32xf32>
    %269 = vector.extract_strided_slice %12 {offsets = [14, 0], sizes = [2, 128], strides = [1, 1]} : vector<16x128xf32> to vector<2x128xf32>
    %cst_47 = arith.constant dense<0.000000e+00> : vector<2x128xf32>
    %270 = tpu.matmul %268, %13, %cst_47 {dimension_numbers = #tpu.dot_dimension_numbers<[1], [0], [0], [1], [0, 0, 1, 1], [], []>} : vector<2x32xf32>, vector<32x128xf32>, vector<2x128xf32> -> vector<2x128xf32>
    %271 = arith.addf %269, %270 : vector<2x128xf32>
    %272 = vector.extract_strided_slice %271 {offsets = [0, 0], sizes = [2, 32], strides = [1, 1]} : vector<2x128xf32> to vector<2x32xf32>
    %273 = arith.negf %272 : vector<2x32xf32>
    %274 = math.exp %273 : vector<2x32xf32>
    %cst_48 = arith.constant 1.000000e+00 : f32
    %275 = vector.broadcast %cst_48 : f32 to vector<2x32xf32>
    %276 = arith.addf %275, %274 : vector<2x32xf32>
    %277 = arith.divf %275, %276 : vector<2x32xf32>
    %278 = vector.extract_strided_slice %271 {offsets = [0, 32], sizes = [2, 32], strides = [1, 1]} : vector<2x128xf32> to vector<2x32xf32>
    %279 = arith.negf %278 : vector<2x32xf32>
    %280 = math.exp %279 : vector<2x32xf32>
    %cst_49 = arith.constant 1.000000e+00 : f32
    %281 = vector.broadcast %cst_49 : f32 to vector<2x32xf32>
    %282 = arith.addf %281, %280 : vector<2x32xf32>
    %283 = arith.divf %281, %282 : vector<2x32xf32>
    %284 = vector.extract_strided_slice %271 {offsets = [0, 64], sizes = [2, 32], strides = [1, 1]} : vector<2x128xf32> to vector<2x32xf32>
    %285 = math.tanh %284 : vector<2x32xf32>
    %286 = arith.mulf %283, %265 : vector<2x32xf32>
    %287 = arith.mulf %277, %285 : vector<2x32xf32>
    %288 = arith.addf %286, %287 : vector<2x32xf32>
    %c7_i32 = arith.constant 7 : i32
    %289 = vector.broadcast %c7_i32 : i32 to vector<2x1xi32>
    %290 = arith.cmpi sgt, %14, %289 : vector<2x1xi32>
    %291 = vector.shape_cast %290 : vector<2x1xi1> to vector<2x1xi1>
    %292 = vector.broadcast %291 : vector<2x1xi1> to vector<2x32xi1>
    %293 = arith.select %292, %288, %265 : vector<2x32xi1>, vector<2x32xf32>
    %c0_50 = arith.constant 0 : index
    %c0_51 = arith.constant 0 : index
    %294 = vector.load %arg9[%c0_50, %c0_51] : memref<32x3xf32, #tpu.memory_space<vmem>>, vector<32x3xf32>
    %cst_52 = arith.constant dense<0.000000e+00> : vector<2x3xf32>
    %295 = tpu.matmul %293, %294, %cst_52 {dimension_numbers = #tpu.dot_dimension_numbers<[1], [0], [0], [1], [0, 0, 1, 1], [], []>} : vector<2x32xf32>, vector<32x3xf32>, vector<2x3xf32> -> vector<2x3xf32>
    %c0_53 = arith.constant 0 : index
    %c0_54 = arith.constant 0 : index
    %296 = vector.load %arg10[%c0_53, %c0_54] : memref<1x3xf32, #tpu.memory_space<vmem>>, vector<1x3xf32>
    %297 = vector.broadcast %296 : vector<1x3xf32> to vector<2x3xf32>
    %298 = arith.addf %295, %297 : vector<2x3xf32>
    %c0_55 = arith.constant 0 : index
    %c0_56 = arith.constant 0 : index
    %299 = vector.load %arg11[%c0_55, %c0_56] : memref<2x3xf32, #tpu.memory_space<vmem>>, vector<2x3xf32>
    tpu.vector_store %arg11[%c0_55, %c0_56], %298 {strides = array<i32>} : memref<2x3xf32, #tpu.memory_space<vmem>>, vector<2x3xf32>,
    return
  }
}

</mosaic_0001>

<bundles_post_ra>
// kernel: tpu_custom_call.1
= control target key start
LH: loop header
LB: loop body
LE: loop exit
PB: predicated region body
PF: predicated region fallthrough
CT: control target
= control target key end

     0   :  { %vm56_vm0 = vcmask 523264   ;;  %s2009_s0 = inlined_call_operand.vmem [shape: s32[2,1], index: 0, kind: input, shape index: {}]   ;;  %s2010_s1 = inlined_call_operand.vmem [shape: f32[16,64], index: 1, kind: input, shape index: {}]   ;;  %s2011_s2 = inlined_call_operand.vmem [shape: f32[64,32], index: 2, kind: input, shape index: {}]   ;;  %s2012_s3 = inlined_call_operand.vmem [shape: f32[1,32], index: 3, kind: input, shape index: {}]   ;;  %s2013_s4 = inlined_call_operand.vmem [shape: f32[32,128], index: 4, kind: input, shape index: {}]   ;;  %s2014_s5 = inlined_call_operand.vmem [shape: f32[32,128], index: 5, kind: input, shape index: {}]   ;;  %s2015_s6 = inlined_call_operand.vmem [shape: f32[1,128], index: 6, kind: input, shape index: {}]   ;;  %s2016_s7 = inlined_call_operand.vmem [shape: f32[2,32], index: 7, kind: input, shape index: {}]   ;;  %s2017_s8 = inlined_call_operand.vmem [shape: f32[2,32], index: 8, kind: input, shape index: {}]   ;;  %s2018_s9 = inlined_call_operand.vmem [shape: f32[32,3], index: 9, kind: input, shape index: {}]   ;;  %s2019_s10 = inlined_call_operand.vmem [shape: f32[1,3], index: 10, kind: input, shape index: {}]   ;;  %s2020_s11 = inlined_call_operand.hbm [shape: f32[2,3], index: 11, kind: output, shape index: {}]  }
   0x1   :  { %v41_v0 = vld [vmem:[%s2011_s2] sm:$0xff]  ;;  %v42_v1 = vld [vmem:[%s2011_s2 + $0x8] sm:$0xff]  ;;  %v43_v2 = vld [vmem:[%s2011_s2 + $0x10] sm:$0xff] }
   0x2   :  { %v1520_v3 = vpack.c.bf16 %v42_v1, %v41_v0  ;;  %v44_v4 = vld [vmem:[%s2011_s2 + $0x18] sm:$0xff]  ;;  %v45_v6 = vld [vmem:[%s2011_s2 + $0x20] sm:$0xff]  ;;  %v46_v7 = vld [vmem:[%s2011_s2 + $0x28] sm:$0xff] }
   0x3   :  { %v1524_v5 = vpack.c.bf16 %v44_v4, %v43_v2  ;;  %v39_v8 = vld [vmem:[%s2010_s1] sm:$0xff]  ;;  %v141_v10 = vld [vmem:[%s2013_s4 + $0x8] sm:$0xff] }
   0x4   :  { %1521 = vmatprep.subr.bf16.mxu0 %v1520_v3  ;;  %1407 = vmatprep.mubr.msk.f32.mxu0 %vm56_vm0, %v39_v8  ;;  %v140_v9 = vld [vmem:[%s2013_s4] sm:$0xff] }
   0x5   :  { %1523 = vmatpush3.bf16.msra.mxu0 %v1520_v3  ;;  %v1536_v11 = vpack.c.bf16 %v141_v10, %v140_v9 }
   0x6   :  { %16 = vsyncpa [#allocation3], 0  ;;  %1525 = vmatprep.subr.bf16.mxu0 %v1524_v5  ;;  %v1528_v12 = vpack.c.bf16 %v46_v7, %v45_v6  ;;  %v47_v13 = vld [vmem:[%s2011_s2 + $0x30] sm:$0xff]  ;;  %v48_v14 = vld [vmem:[%s2011_s2 + $0x38] sm:$0xff]  ;;  %v1694_v23 = vmov 0.0|0.0   ;;  %vm1695_vm1 = vmmov 0  }
   0x7   :  { %1537 = vmatprep.subr.bf16.mxu1 %v1536_v11  ;;  %v1532_v15 = vpack.c.bf16 %v48_v14, %v47_v13  ;;  %v40_v16 = vld [vmem:[%s2010_s1 + $0x8] sm:$0xff]  ;;  %v142_v17 = vld [vmem:[%s2013_s4 + $0x10] sm:$0xff]  ;;  %v143_v18 = vld [vmem:[%s2013_s4 + $0x18] sm:$0xff]  ;;  %v1696_v27 = vmov 0.0   ;;  %vm151_vm2 = vcmask 261120   ;;  %v1697_v44 = vmov 0  }
   0x8   :  { %1539 = vmatpush3.bf16.msra.mxu1 %v1536_v11  ;;  %v1540_v19 = vpack.c.bf16 %v143_v18, %v142_v17  ;;  %v233_v20 = vld [vmem:[%s2014_s5] sm:$0xff]  ;;  %v234_v21 = vld [vmem:[%s2014_s5 + $0x8] sm:$0xff]  ;;  %v235_v24 = vld [vmem:[%s2014_s5 + $0x10] sm:$0xff]  ;;  %1606 = vset.pattern.permute.xlu1 %v1697_v44  ;;  %s1699_s17 = smov 32   ;;  %s1701_s27 = smov [#allocation2]  }
   0x9   :  { %1527 = vmatpush3.bf16.msra.mxu0 %v1524_v5  ;;  %v1812_v22 = vpack.c.bf16 %v234_v21, %v233_v20  ;;  %v236_v25 = vld [vmem:[%s2014_s5 + $0x18] sm:$0xff]  ;;  %v1306_v28 = vld [vmem:[%s2012_s3] ss:$0 sm:$0xff]  ;;  %1607 = vset.pattern.permute.xlu0 %v1697_v44  ;;  %s1298_s28 = sshll.u32 %s1701_s27, 4  ;;  %s1299_s28 = int_to_ptr.vmem [resolvable:$true] %s1298_s28 }
   0xa   :  { %1529 = vmatprep.subr.bf16.mxu0 %v1528_v12  ;;  %1541 = vmatprep.subr.bf16.mxu1 %v1540_v19  ;;  %v1824_v26 = vpack.c.bf16 %v236_v25, %v235_v24  ;;  %v238_v35 = vld [vmem:[%s2016_s7] sm:$0x3]  ;;  %s1698_s7 = smov 64   ;;  %s1670_s1 = scalar_lea.vmem %s1299_s28, 32 }
   0xb   :  { %v1309_v36 = vld [vmem:[%s2015_s6] ss:$0 sm:$0xff]  ;;  %p1671_p0 = scmp.ne.s32.totalorder %s1299_s28, %s1670_s1  ;;  %p1675_p1 = scmp.lt.s32.totalorder %s1299_s28, %s1299_s28 }
   0xc   :  { %1543 = vmatpush3.bf16.msra.mxu1 %v1540_v19  ;;  %v239_v46 = vld [vmem:[%s2017_s8] sm:$0x3]  ;;  %s1700_s8 = smov 96   ;;  %p1676_p2 = scmp.lt.s32.totalorder %s1670_s1, %s1670_s1 }
   0xd   :  { %1531 = vmatpush3.bf16.msra.mxu0 %v1528_v12  ;;  %1544 = vmatprep.subr.bf16.mxu1 %v1694_v23  ;;  %v1869_v50 = vld [vmem:[%s2009_s0] sm:$0x3] }
   0xe   :  { %1533 = vmatprep.subr.bf16.mxu0 %v1532_v15  ;;  %vm342_vm3 = vcmp.gt.s32.totalorder %v1869_v50, 0  ;;  %vm459_vm5 = vcmp.gt.s32.totalorder %v1869_v50, 1  ;;  %vm587_vm7 = vcmp.gt.s32.totalorder %v1869_v50, 2  ;;  %vm711_vm9 = vcmp.gt.s32.totalorder %v1869_v50, 3  ;;  %p1677_p3 = por %p1676_p2, %p1675_p1 }
   0xf   :  { %v343_v54 = vsel %vm342_vm3, 1, %v1697_v44  ;;  %v460_v13 = vsel %vm459_vm5, 1, %v1697_v44  ;;  %vm831_vm11 = vcmp.gt.s32.totalorder %v1869_v50, 4  ;;  %vm948_vm13 = vcmp.gt.s32.totalorder %v1869_v50, 5 }
  0x10   :  { %vm1076_vm15 = vcmp.gt.s32.totalorder %v1869_v50, 6  ;;  %p1678_p4 = pnand %p1677_p3, %p1671_p0 }
  0x11   :  { %1535 = vmatpush3.bf16.msra.mxu0 %v1532_v15 }
  0x12   :  { %1550 = vmatprep.subr.bf16.mxu0 %v1694_v23 }
  0x14   :  { %1408 = vmatmul.mubr.msk.f32.vlgmr.msra.gmra.mrb[0].mxu0 %vm56_vm0, %v40_v16 }
  0x15   :  { %1552 = vmatpush3.bf16.msra.mxu0 %v1812_v22  ;;  %1440 = vmatprep.mubr.msk.f32.mxu0 %vm1695_vm1, %v1696_v27 }
  0x16   :  { %1553 = vmatprep.subr.bf16.mxu0 %v1694_v23 }
  0x19   :  { %1555 = vmatpush3.bf16.msra.mxu0 %v1824_v26 }
  0x1a   :  { %1562 = vmatprep.subr.bf16.mxu0 %v1694_v23 }
  0xe7   :  { %v1409_v29 = vpop.f32.mrb[0].mxu0 }
  0xe8   :  { %v135_v30 = vadd.f32 %v1409_v29, %v1306_v28  ;;  %v129_v31 = vpop.f32.mrb[1].mxu0 }
  0xe9   :  { %v130_v32 = vadd.f32 %v1306_v28, %v129_v31 }
  0xea   :  { %v139_v34 = vmax.f32 %v135_v30, 0.0 }
  0xeb   :  { %v138_v33 = vmax.f32 %v130_v32, 0.0 }
  0xed   :  { %1418 = vmatprep.mubr.msk.f32.mxu1 %vm151_vm2, %v138_v33 }
  0xee   :  { %1419 = vmatmul.mubr.msk.f32.vlgmr.msra.gmra.mrb[0].mxu1 %vm151_vm2, %v139_v34 }
  0xef   :  { %1546 = vmatpush3.bf16.msra.mxu1 %v1812_v22  ;;  %1429 = vmatprep.mubr.msk.f32.mxu1 %vm1695_vm1, %v1696_v27 }
  0xf0   :  { %1547 = vmatprep.subr.bf16.mxu1 %v1694_v23 }
  0xf3   :  { %1549 = vmatpush3.bf16.msra.mxu1 %v1824_v26 }
  0xf4   :  { %1556 = vmatprep.subr.bf16.mxu1 %v1694_v23 }
  0xf6   :  { %1430 = vmatmul.mubr.msk.f32.vlgmr.msra.gmra.mrb[2].mxu1 %vm151_vm2, %v238_v35 }
  0xf7   :  { %1558 = vmatpush3.bf16.msra.mxu1 %v1812_v22  ;;  %1451 = vmatprep.mubr.msk.f32.mxu1 %vm1695_vm1, %v1696_v27 }
  0xf8   :  { %1559 = vmatprep.subr.bf16.mxu1 %v1694_v23 }
  0xfb   :  { %1561 = vmatpush3.bf16.msra.mxu1 %v1824_v26 }
  0xfc   :  { %1568 = vmatprep.subr.bf16.mxu1 %v1694_v23 }
 0x1c1   :  { %v1420_v37 = vpop.f32.mrb[0].mxu1 }
 0x1c2   :  { %v1854_v38 = vadd.f32 %v1420_v37, %v1309_v36  ;;  %v224_v39 = vpop.f32.mrb[1].mxu1 }
 0x1c3   :  { %v1856_v40 = vadd.f32 %v1309_v36, %v224_v39 }
 0x1c9   :  { %v309_v41 = vpop.f32.mrb[2].mxu1 }
 0x1ca   :  { %v313_v42 = vadd.f32 %v309_v41, %v1856_v40  ;;  %v1431_v43 = vpop.f32.mrb[3].mxu1 }
 0x1cc   :  { %1608 = vtanh.f32 %v313_v42  ;;  %v1313_v47 = vmul.f32 -1.442695, %v313_v42 }
 0x1ce   :  { %1610 = vpow2.f32 %v1313_v47 }
 0x1d6   :  { %v1609_v45 = vpop.eup %1608 }
 0x1d7   :  { %327 = vrot.lane.b32.xlu0 %v1609_v45, %s1698_s7 }
 0x1d8   :  { %v1611_v48 = vpop.eup %1610 }
 0x1d9   :  { %v317_v49 = vadd.f32 1.0, %v1611_v48 }
 0x1db   :  { %322 = vrot.lane.b32.xlu0 %v239_v46, %s1699_s17  ;;  %1612 = vrcp.f32 %v317_v49  ;;  %v588_v49 = vsel %vm587_vm7, 1, %v1697_v44 }
 0x1e5   :  { %v1613_v51 = vpop.eup %1612 }
 0x249   :  { %v328_v52 = vpop.permute.xlu0 %327 }
 0x24a   :  { %v330_v53 = vmul.f32 %v1613_v51, %v328_v52 }
 0x24c   :  { %332 = vrot.lane.b32.xlu1 %v330_v53, %s1699_s17 }
 0x24d   :  { %v323_v55 = vpop.permute.xlu0 %322 }
 0x24e   :  { %v325_v56 = vmul.f32 %v1613_v51, %v323_v55 }
 0x250   :  { %345 = vperm.xlu1 %1606, %v343_v54  }
 0x254   :  { %349 = vrot.lane.b32.xlu1 %v238_v35, %s1700_s8 }
 0x2be   :  { %v333_v57 = vpop.permute.xlu1 %332 }
 0x2bf   :  { %v335_v58 = vadd.f32 %v333_v57, %v325_v56 }
 0x2c1   :  { %1614 = vtanh.f32 %v335_v58 }
 0x2cb   :  { %v1615_v59 = vpop.eup %1614 }
 0x2cc   :  { %338 = vrot.lane.b32.xlu0 %v1615_v59, %s1698_s7 }
 0x2cf   :  { %v346_v60 = vpop.permute.xlu1 %345 }
 0x2d0   :  { %vm347_vm4 = vcmp.eq.s32.totalorder %v346_v60, 1 }
 0x2d1   :  { %v348_v14 = vsel %vm347_vm4, %v335_v58, %v323_v55 }
 0x2d2   :  { %v440_v15 = vrot.slane %v348_v14, 6 }
 0x2d3   :  { %v350_v62 = vpop.permute.xlu1 %349 }
 0x33e   :  { %v339_v61 = vpop.permute.xlu0 %338 }
 0x33f   :  { %v341_v63 = vmul.f32 %v1613_v51, %v339_v61 }
 0x341   :  { %v352_v0 = vsel %vm347_vm4, %v341_v63, %v350_v62  ;;  %vm1290_vm4 = vcmask 17408  }
 0x342   :  { %354 = vrot.lane.b32.xlu0 %v352_v0, %s1699_s17 }
 0x3b4   :  { %v355_v1 = vpop.permute.xlu0 %354 }
 0x3b5   :  { %1441 = vmatmul.mubr.msk.f32.vlgmr.msra.gmra.mrb[2].mxu0 %vm151_vm2, %v355_v1 }
 0x3b6   :  { %1564 = vmatpush3.bf16.msra.mxu0 %v1812_v22  ;;  %1462 = vmatprep.mubr.msk.f32.mxu0 %vm1695_vm1, %v1696_v27 }
 0x3b7   :  { %1565 = vmatprep.subr.bf16.mxu0 %v1694_v23 }
 0x3ba   :  { %1567 = vmatpush3.bf16.msra.mxu0 %v1824_v26 }
 0x3bb   :  { %1574 = vmatprep.subr.bf16.mxu0 %v1694_v23 }
 0x488   :  { %v424_v2 = vpop.f32.mrb[2].mxu0 }
 0x489   :  { %v429_v3 = vrot.slane %v424_v2, 6  ;;  %v1442_v4 = vpop.f32.mrb[3].mxu0 }
 0x48b   :  { %v431_v5 = vadd.f32 %v429_v3, %v1856_v40 }
 0x48d   :  { %1616 = vtanh.f32 %v431_v5  ;;  %v1315_v7 = vmul.f32 -1.442695, %v431_v5 }
 0x48f   :  { %1618 = vpow2.f32 %v1315_v7 }
 0x497   :  { %v1617_v6 = vpop.eup %1616 }
 0x498   :  { %444 = vrot.lane.b32.xlu1 %v1617_v6, %s1698_s7 }
 0x499   :  { %v1619_v8 = vpop.eup %1618 }
 0x49a   :  { %v435_v9 = vadd.f32 1.0, %v1619_v8 }
 0x49c   :  { %1620 = vrcp.f32 %v435_v9 }
 0x4a6   :  { %v1621_v10 = vpop.eup %1620 }
 0x4a7   :  { %v442_v16 = vmul.f32 %v1621_v10, %v440_v15 }
 0x50a   :  { %v445_v11 = vpop.permute.xlu1 %444 }
 0x50b   :  { %v447_v12 = vmul.f32 %v1621_v10, %v445_v11 }
 0x50d   :  { %449 = vrot.lane.b32.xlu0 %v447_v12, %s1699_s17 }
 0x511   :  { %462 = vperm.xlu0 %1607, %v460_v13   ;;  %v712_v13 = vsel %vm711_vm9, 1, %v1697_v44 }
 0x515   :  { %470 = vrot.lane.b32.xlu0 %v348_v14, %s1700_s8 }
 0x57f   :  { %v450_v17 = vpop.permute.xlu0 %449 }
 0x580   :  { %v452_v18 = vadd.f32 %v450_v17, %v442_v16 }
 0x582   :  { %1622 = vtanh.f32 %v452_v18  ;;  %v466_v25 = vrot.slane %v452_v18, 2 }
 0x58c   :  { %v1623_v19 = vpop.eup %1622 }
 0x58d   :  { %455 = vrot.lane.b32.xlu1 %v1623_v19, %s1698_s7 }
 0x590   :  { %v463_v28 = vpop.permute.xlu0 %462 }
 0x591   :  { %vm464_vm6 = vcmp.eq.s32.totalorder %v463_v28, 1 }
 0x594   :  { %v471_v31 = vpop.permute.xlu0 %470 }
 0x5ff   :  { %v456_v20 = vpop.permute.xlu1 %455 }
 0x600   :  { %v458_v21 = vmul.f32 %v1621_v10, %v456_v20 }
 0x602   :  { %v475_v24 = vrot.slane %v458_v21, 2 }
 0x604   :  { %476 = vrot.lane.b32.xlu1 %v475_v24, %s1699_s17  ;;  %v832_v24 = vsel %vm831_vm11, 1, %v1697_v44 }
 0x608   :  { %467 = vrot.lane.b32.xlu1 %v466_v25, %s1700_s8 }
 0x676   :  { %v477_v29 = vpop.permute.xlu1 %476 }
 0x677   :  { %v480_v30 = vsel %vm464_vm6, %v477_v29, %v355_v1 }
 0x678   :  { %1452 = vmatmul.mubr.msk.f32.vlgmr.msra.gmra.mrb[4].mxu1 %vm151_vm2, %v480_v30 }
 0x679   :  { %1570 = vmatpush3.bf16.msra.mxu1 %v1812_v22  ;;  %1473 = vmatprep.mubr.msk.f32.mxu1 %vm1695_vm1, %v1696_v27 }
 0x67a   :  { %v468_v32 = vpop.permute.xlu1 %467  ;;  %1571 = vmatprep.subr.bf16.mxu1 %v1694_v23 }
 0x67b   :  { %v473_v33 = vsel %vm464_vm6, %v468_v32, %v471_v31 }
 0x67c   :  { %v566_v34 = vrot.slane %v473_v33, 4 }
 0x67d   :  { %1573 = vmatpush3.bf16.msra.mxu1 %v1824_v26 }
 0x67e   :  { %567 = vrot.lane.b32.xlu0 %v566_v34, %s1699_s17  ;;  %1580 = vmatprep.subr.bf16.mxu1 %v1694_v23 }
 0x6f0   :  { %v568_v51 = vpop.permute.xlu0 %567 }
 0x74b   :  { %v550_v35 = vpop.f32.mrb[4].mxu1 }
 0x74c   :  { %v555_v36 = vrot.slane %v550_v35, 4  ;;  %v1453_v37 = vpop.f32.mrb[5].mxu1 }
 0x74e   :  { %v557_v39 = vadd.f32 %v555_v36, %v1856_v40 }
 0x750   :  { %1624 = vtanh.f32 %v557_v39  ;;  %v1317_v42 = vmul.f32 -1.442695, %v557_v39 }
 0x752   :  { %1626 = vpow2.f32 %v1317_v42 }
 0x75a   :  { %v1625_v41 = vpop.eup %1624 }
 0x75b   :  { %572 = vrot.lane.b32.xlu1 %v1625_v41, %s1698_s7 }
 0x75c   :  { %v1627_v43 = vpop.eup %1626 }
 0x75d   :  { %v561_v45 = vadd.f32 1.0, %v1627_v43 }
 0x75f   :  { %1628 = vrcp.f32 %v561_v45 }
 0x769   :  { %v1629_v46 = vpop.eup %1628 }
 0x76a   :  { %v570_v52 = vmul.f32 %v1629_v46, %v568_v51 }
 0x7cd   :  { %v573_v47 = vpop.permute.xlu1 %572 }
 0x7ce   :  { %v575_v48 = vmul.f32 %v1629_v46, %v573_v47 }
 0x7d0   :  { %577 = vrot.lane.b32.xlu1 %v575_v48, %s1699_s17 }
 0x7d4   :  { %590 = vperm.xlu1 %1606, %v588_v49  }
 0x842   :  { %v578_v53 = vpop.permute.xlu1 %577 }
 0x843   :  { %v580_v54 = vadd.f32 %v578_v53, %v570_v52 }
 0x845   :  { %1630 = vtanh.f32 %v580_v54  ;;  %v594_v55 = vrot.slane %v580_v54, 4 }
 0x847   :  { %595 = vrot.lane.b32.xlu1 %v594_v55, %s1700_s8 }
 0x84f   :  { %v1631_v56 = vpop.eup %1630 }
 0x850   :  { %583 = vrot.lane.b32.xlu0 %v1631_v56, %s1698_s7 }
 0x853   :  { %v591_v57 = vpop.permute.xlu1 %590 }
 0x854   :  { %vm592_vm8 = vcmp.eq.s32.totalorder %v591_v57, 1 }
 0x8b9   :  { %v596_v58 = vpop.permute.xlu1 %595 }
 0x8ba   :  { %v598_v59 = vsel %vm592_vm8, %v596_v58, %v473_v33 }
 0x8bb   :  { %v690_v60 = vrot.slane %v598_v59, 2 }
 0x8bd   :  { %691 = vrot.lane.b32.xlu1 %v690_v60, %s1699_s17 }
 0x8c2   :  { %v584_v61 = vpop.permute.xlu0 %583 }
 0x8c3   :  { %v586_v62 = vmul.f32 %v1629_v46, %v584_v61 }
 0x8c5   :  { %v600_v63 = vrot.slane %v586_v62, 4 }
 0x8c7   :  { %601 = vrot.lane.b32.xlu0 %v600_v63, %s1699_s17 }
 0x939   :  { %v602_v0 = vpop.permute.xlu0 %601 }
 0x93a   :  { %v604_v1 = vsel %vm592_vm8, %v602_v0, %v480_v30 }
 0x93b   :  { %1463 = vmatmul.mubr.msk.f32.vlgmr.msra.gmra.mrb[4].mxu0 %vm151_vm2, %v604_v1 }
 0x93c   :  { %1576 = vmatpush3.bf16.msra.mxu0 %v1812_v22  ;;  %1484 = vmatprep.mubr.msk.f32.mxu0 %vm1695_vm1, %v1696_v27 }
 0x93d   :  { %1577 = vmatprep.subr.bf16.mxu0 %v1694_v23 }
 0x940   :  { %1579 = vmatpush3.bf16.msra.mxu0 %v1824_v26 }
 0x941   :  { %1586 = vmatprep.subr.bf16.mxu0 %v1694_v23 }
 0xa0e   :  { %v674_v2 = vpop.f32.mrb[4].mxu0 }
 0xa0f   :  { %v679_v3 = vrot.slane %v674_v2, 2  ;;  %v1464_v4 = vpop.f32.mrb[5].mxu0 }
 0xa11   :  { %v681_v5 = vadd.f32 %v679_v3, %v1856_v40  ;;  %v692_v40 = vpop.permute.xlu1 %691 }
 0xa13   :  { %1632 = vtanh.f32 %v681_v5  ;;  %v1319_v7 = vmul.f32 -1.442695, %v681_v5 }
 0xa15   :  { %1634 = vpow2.f32 %v1319_v7 }
 0xa1d   :  { %v1633_v6 = vpop.eup %1632 }
 0xa1e   :  { %696 = vrot.lane.b32.xlu0 %v1633_v6, %s1698_s7 }
 0xa1f   :  { %v1635_v8 = vpop.eup %1634 }
 0xa20   :  { %v685_v9 = vadd.f32 1.0, %v1635_v8 }
 0xa22   :  { %1636 = vrcp.f32 %v685_v9 }
 0xa2c   :  { %v1637_v10 = vpop.eup %1636 }
 0xa2d   :  { %v694_v14 = vmul.f32 %v1637_v10, %v692_v40 }
 0xa90   :  { %v697_v11 = vpop.permute.xlu0 %696 }
 0xa91   :  { %v699_v12 = vmul.f32 %v1637_v10, %v697_v11 }
 0xa93   :  { %701 = vrot.lane.b32.xlu0 %v699_v12, %s1699_s17 }
 0xa97   :  { %714 = vperm.xlu0 %1607, %v712_v13  }
 0xb05   :  { %v702_v15 = vpop.permute.xlu0 %701 }
 0xb06   :  { %v704_v16 = vadd.f32 %v702_v15, %v694_v14 }
 0xb08   :  { %1638 = vtanh.f32 %v704_v16  ;;  %v718_v17 = vrot.slane %v704_v16, 6 }
 0xb0a   :  { %719 = vrot.lane.b32.xlu0 %v718_v17, %s1700_s8 }
 0xb12   :  { %v1639_v18 = vpop.eup %1638 }
 0xb13   :  { %707 = vrot.lane.b32.xlu1 %v1639_v18, %s1698_s7 }
 0xb16   :  { %v715_v19 = vpop.permute.xlu0 %714 }
 0xb17   :  { %vm716_vm10 = vcmp.eq.s32.totalorder %v715_v19, 1 }
 0xb7c   :  { %v720_v20 = vpop.permute.xlu0 %719 }
 0xb7d   :  { %v722_v21 = vsel %vm716_vm10, %v720_v20, %v598_v59 }
 0xb7e   :  { %811 = vrot.lane.b32.xlu0 %v722_v21, %s1699_s17 }
 0xb82   :  { %834 = vperm.xlu0 %1607, %v832_v24  }
 0xb85   :  { %v708_v25 = vpop.permute.xlu1 %707 }
 0xb86   :  { %v710_v28 = vmul.f32 %v1637_v10, %v708_v25 }
 0xb88   :  { %v724_v29 = vrot.slane %v710_v28, 6 }
 0xb8a   :  { %725 = vrot.lane.b32.xlu1 %v724_v29, %s1699_s17 }
 0xbf0   :  { %v812_v45 = vpop.permute.xlu0 %811 }
 0xbfc   :  { %v726_v30 = vpop.permute.xlu1 %725 }
 0xbfd   :  { %v728_v31 = vsel %vm716_vm10, %v726_v30, %v604_v1 }
 0xbfe   :  { %838 = vrot.lane.b32.xlu0 %v728_v31, %s1700_s8  ;;  %1474 = vmatmul.mubr.msk.f32.vlgmr.msra.gmra.mrb[6].mxu1 %vm151_vm2, %v728_v31 }
 0xbff   :  { %1582 = vmatpush3.bf16.msra.mxu1 %v1812_v22  ;;  %1495 = vmatprep.mubr.msk.f32.mxu1 %vm1695_vm1, %v1696_v27 }
 0xc00   :  { %1583 = vmatprep.subr.bf16.mxu1 %v1694_v23 }
 0xc01   :  { %v835_v51 = vpop.permute.xlu0 %834 }
 0xc02   :  { %vm836_vm12 = vcmp.eq.s32.totalorder %v835_v51, 1 }
 0xc03   :  { %1585 = vmatpush3.bf16.msra.mxu1 %v1824_v26 }
 0xc04   :  { %1592 = vmatprep.subr.bf16.mxu1 %v1694_v23 }
 0xc70   :  { %v839_v54 = vpop.permute.xlu0 %838 }
 0xcd1   :  { %v798_v32 = vpop.f32.mrb[6].mxu1 }
 0xcd2   :  { %v802_v33 = vadd.f32 %v798_v32, %v1854_v38  ;;  %v1475_v34 = vpop.f32.mrb[7].mxu1 }
 0xcd4   :  { %1640 = vtanh.f32 %v802_v33  ;;  %v1321_v36 = vmul.f32 -1.442695, %v802_v33  ;;  %v1077_v33 = vsel %vm1076_vm15, 1, %v1697_v44 }
 0xcd6   :  { %1642 = vpow2.f32 %v1321_v36 }
 0xcde   :  { %v1641_v35 = vpop.eup %1640 }
 0xcdf   :  { %816 = vrot.lane.b32.xlu1 %v1641_v35, %s1698_s7 }
 0xce0   :  { %v1643_v37 = vpop.eup %1642 }
 0xce1   :  { %v806_v39 = vadd.f32 1.0, %v1643_v37 }
 0xce3   :  { %1644 = vrcp.f32 %v806_v39 }
 0xced   :  { %v1645_v41 = vpop.eup %1644 }
 0xcee   :  { %v814_v46 = vmul.f32 %v1645_v41, %v812_v45 }
 0xd51   :  { %v817_v42 = vpop.permute.xlu1 %816 }
 0xd52   :  { %v819_v43 = vmul.f32 %v1645_v41, %v817_v42 }
 0xd54   :  { %821 = vrot.lane.b32.xlu1 %v819_v43, %s1699_s17 }
 0xdc6   :  { %v822_v47 = vpop.permute.xlu1 %821 }
 0xdc7   :  { %v824_v48 = vadd.f32 %v822_v47, %v814_v46 }
 0xdc9   :  { %1646 = vtanh.f32 %v824_v48  ;;  %v837_v3 = vsel %vm836_vm12, %v824_v48, %v812_v45 }
 0xdca   :  { %v929_v4 = vrot.slane %v837_v3, 6 }
 0xdd3   :  { %v1647_v49 = vpop.eup %1646 }
 0xdd4   :  { %827 = vrot.lane.b32.xlu1 %v1647_v49, %s1698_s7 }
 0xe46   :  { %v828_v52 = vpop.permute.xlu1 %827 }
 0xe47   :  { %v830_v53 = vmul.f32 %v1645_v41, %v828_v52 }
 0xe49   :  { %v841_v55 = vsel %vm836_vm12, %v830_v53, %v839_v54 }
 0xe4a   :  { %843 = vrot.lane.b32.xlu1 %v841_v55, %s1699_s17 }
 0xebc   :  { %v844_v56 = vpop.permute.xlu1 %843 }
 0xebd   :  { %1485 = vmatmul.mubr.msk.f32.vlgmr.msra.gmra.mrb[6].mxu0 %vm151_vm2, %v844_v56 }
 0xebe   :  { %1588 = vmatpush3.bf16.msra.mxu0 %v1812_v22  ;;  %1506 = vmatprep.mubr.msk.f32.mxu0 %vm1695_vm1, %v1696_v27 }
 0xebf   :  { %1589 = vmatprep.subr.bf16.mxu0 %v1694_v23 }
 0xec2   :  { %1591 = vmatpush3.bf16.msra.mxu0 %v1824_v26  ;;  %v949_v26 = vsel %vm948_vm13, 1, %v1697_v44 }
 0xf90   :  { %v913_v57 = vpop.f32.mrb[6].mxu0 }
 0xf91   :  { %v918_v58 = vrot.slane %v913_v57, 6  ;;  %v1486_v59 = vpop.f32.mrb[7].mxu0 }
 0xf93   :  { %v920_v60 = vadd.f32 %v918_v58, %v1854_v38 }
 0xf95   :  { %1648 = vtanh.f32 %v920_v60  ;;  %v1323_v62 = vmul.f32 -1.442695, %v920_v60  ;;  %v1206_v60 = vld [vmem:[%s2018_s9] sm:$0xff] }
 0xf97   :  { %1650 = vpow2.f32 %v1323_v62 }
 0xf9f   :  { %v1649_v61 = vpop.eup %1648 }
 0xfa0   :  { %933 = vrot.lane.b32.xlu0 %v1649_v61, %s1698_s7  ;;  %v1207_v61 = vld [vmem:[%s2018_s9 + $0x8] sm:$0xff] }
 0xfa1   :  { %v1651_v63 = vpop.eup %1650  ;;  %v1593_v62 = vpack.c.bf16 %v1207_v61, %v1206_v60 }
 0xfa2   :  { %v924_v22 = vadd.f32 1.0, %v1651_v63  ;;  %v1209_v63 = vld [vmem:[%s2018_s9 + $0x18] sm:$0xff] }
 0xfa4   :  { %1652 = vrcp.f32 %v924_v22 }
 0xfae   :  { %v1653_v0 = vpop.eup %1652 }
 0xfaf   :  { %v931_v5 = vmul.f32 %v1653_v0, %v929_v4 }
0x1012   :  { %v934_v1 = vpop.permute.xlu0 %933 }
0x1013   :  { %v936_v2 = vmul.f32 %v1653_v0, %v934_v1 }
0x1015   :  { %938 = vrot.lane.b32.xlu1 %v936_v2, %s1699_s17 }
0x1019   :  { %951 = vperm.xlu1 %1606, %v949_v26  }
0x1087   :  { %v939_v6 = vpop.permute.xlu1 %938 }
0x1088   :  { %v941_v7 = vadd.f32 %v939_v6, %v931_v5 }
0x108a   :  { %1654 = vtanh.f32 %v941_v7  ;;  %v955_v8 = vrot.slane %v941_v7, 2 }
0x108c   :  { %956 = vrot.lane.b32.xlu1 %v955_v8, %s1700_s8 }
0x1094   :  { %v1655_v9 = vpop.eup %1654 }
0x1095   :  { %944 = vrot.lane.b32.xlu0 %v1655_v9, %s1698_s7 }
0x1098   :  { %v952_v13 = vpop.permute.xlu1 %951 }
0x1099   :  { %vm953_vm14 = vcmp.eq.s32.totalorder %v952_v13, 1 }
0x10fe   :  { %v957_v15 = vpop.permute.xlu1 %956 }
0x1107   :  { %v945_v10 = vpop.permute.xlu0 %944 }
0x1108   :  { %v947_v11 = vmul.f32 %v1653_v0, %v945_v10 }
0x110a   :  { %v964_v12 = vrot.slane %v947_v11, 2 }
0x110c   :  { %965 = vrot.lane.b32.xlu0 %v964_v12, %s1699_s17 }
0x1110   :  { %959 = vrot.lane.b32.xlu0 %v837_v3, %s1700_s8 }
0x117e   :  { %v966_v40 = vpop.permute.xlu0 %965 }
0x117f   :  { %v969_v14 = vsel %vm953_vm14, %v966_v40, %v844_v56 }
0x1180   :  { %1496 = vmatmul.mubr.msk.f32.vlgmr.msra.gmra.mrb[8].mxu1 %vm151_vm2, %v969_v14 }
0x1181   :  { %1517 = vmatprep.mubr.msk.f32.mxu1 %vm1695_vm1, %v1696_v27  ;;  %vm1194_vm1 = vcmp.gt.s32.totalorder %v1869_v50, 7  ;;  %1594 = vmatpush3.bf16.msra.mxu1 %v1593_v62 }
0x1182   :  { %v960_v16 = vpop.permute.xlu0 %959  ;;  %v1195_v47 = vsel %vm1194_vm1, 1, %v1697_v44  ;;  %1595 = vmatprep.subr.bf16.mxu1 %v1694_v23  ;;  %v1328_v23 = vld [vmem:[%s2019_s10] ss:$0 sm:$0xff] }
0x1183   :  { %v962_v17 = vsel %vm953_vm14, %v957_v15, %v960_v16 }
0x1184   :  { %v1055_v18 = vrot.slane %v962_v17, 4 }
0x1186   :  { %1056 = vrot.lane.b32.xlu0 %v1055_v18, %s1699_s17 }
0x11f8   :  { %v1057_v34 = vpop.permute.xlu0 %1056 }
0x1253   :  { %v1039_v19 = vpop.f32.mrb[8].mxu1 }
0x1254   :  { %v1044_v20 = vrot.slane %v1039_v19, 4  ;;  %v1497_v21 = vpop.f32.mrb[9].mxu1 }
0x1256   :  { %v1046_v24 = vadd.f32 %v1044_v20, %v1854_v38 }
0x1258   :  { %1656 = vtanh.f32 %v1046_v24  ;;  %v1325_v28 = vmul.f32 -1.442695, %v1046_v24 }
0x125a   :  { %1658 = vpow2.f32 %v1325_v28 }
0x1262   :  { %v1657_v25 = vpop.eup %1656 }
0x1263   :  { %1061 = vrot.lane.b32.xlu1 %v1657_v25, %s1698_s7 }
0x1264   :  { %v1659_v29 = vpop.eup %1658 }
0x1265   :  { %v1050_v30 = vadd.f32 1.0, %v1659_v29 }
0x1267   :  { %1660 = vrcp.f32 %v1050_v30 }
0x1271   :  { %v1661_v27 = vpop.eup %1660 }
0x1272   :  { %v1059_v35 = vmul.f32 %v1661_v27, %v1057_v34 }
0x12d5   :  { %v1062_v31 = vpop.permute.xlu1 %1061 }
0x12d6   :  { %v1064_v32 = vmul.f32 %v1661_v27, %v1062_v31 }
0x12d8   :  { %1066 = vrot.lane.b32.xlu1 %v1064_v32, %s1699_s17 }
0x12dc   :  { %1079 = vperm.xlu1 %1606, %v1077_v33  }
0x134a   :  { %v1067_v36 = vpop.permute.xlu1 %1066 }
0x134b   :  { %v1069_v37 = vadd.f32 %v1067_v36, %v1059_v35 }
0x134d   :  { %1662 = vtanh.f32 %v1069_v37  ;;  %v1083_v39 = vrot.slane %v1069_v37, 4 }
0x134f   :  { %1084 = vrot.lane.b32.xlu1 %v1083_v39, %s1700_s8 }
0x1357   :  { %v1663_v41 = vpop.eup %1662 }
0x1358   :  { %1072 = vrot.lane.b32.xlu0 %v1663_v41, %s1698_s7 }
0x135b   :  { %v1080_v42 = vpop.permute.xlu1 %1079 }
0x135c   :  { %vm1081_vm0 = vcmp.eq.s32.totalorder %v1080_v42, 1 }
0x13c1   :  { %v1085_v43 = vpop.permute.xlu1 %1084 }
0x13c2   :  { %v1087_v45 = vsel %vm1081_vm0, %v1085_v43, %v962_v17 }
0x13c3   :  { %v1179_v46 = vrot.slane %v1087_v45, 2 }
0x13c5   :  { %1180 = vrot.lane.b32.xlu1 %v1179_v46, %s1699_s17 }
0x13c9   :  { %1197 = vperm.xlu1 %1606, %v1195_v47  }
0x13ca   :  { %v1073_v48 = vpop.permute.xlu0 %1072 }
0x13cb   :  { %v1075_v49 = vmul.f32 %v1661_v27, %v1073_v48 }
0x13cd   :  { %v1089_v51 = vrot.slane %v1075_v49, 4 }
0x13cf   :  { %1090 = vrot.lane.b32.xlu0 %v1089_v51, %s1699_s17 }
0x1437   :  { %v1181_v26 = vpop.permute.xlu1 %1180 }
0x1441   :  { %v1091_v52 = vpop.permute.xlu0 %1090 }
0x1442   :  { %v1093_v53 = vsel %vm1081_vm0, %v1091_v52, %v969_v14 }
0x1443   :  { %1507 = vmatmul.mubr.msk.f32.vlgmr.msra.gmra.mrb[8].mxu0 %vm151_vm2, %v1093_v53 }
0x1448   :  { %v1198_v7 = vpop.permute.xlu1 %1197 }
0x1449   :  { %vm1199_vm3 = vcmp.eq.s32.totalorder %v1198_v7, 1 }
0x1516   :  { %v1163_v54 = vpop.f32.mrb[8].mxu0 }
0x1517   :  { %v1168_v55 = vrot.slane %v1163_v54, 2  ;;  %v1508_v56 = vpop.f32.mrb[9].mxu0 }
0x1519   :  { %v1170_v57 = vadd.f32 %v1168_v55, %v1854_v38  ;;  %v1208_v38 = vld [vmem:[%s2018_s9 + $0x10] sm:$0xff] }
0x151a   :  { %v1596_v22 = vpack.c.bf16 %v1209_v63, %v1208_v38 }
0x151b   :  { %1664 = vtanh.f32 %v1170_v57  ;;  %v1327_v44 = vmul.f32 -1.442695, %v1170_v57 }
0x151c   :  { %1597 = vmatpush3.bf16.msra.mxu1 %v1596_v22 }
0x151d   :  { %1666 = vpow2.f32 %v1327_v44 }
0x1525   :  { %v1665_v50 = vpop.eup %1664 }
0x1526   :  { %1185 = vrot.lane.b32.xlu0 %v1665_v50, %s1698_s7 }
0x1527   :  { %v1667_v58 = vpop.eup %1666 }
0x1528   :  { %v1174_v59 = vadd.f32 1.0, %v1667_v58 }
0x152a   :  { %1668 = vrcp.f32 %v1174_v59 }
0x1534   :  { %v1669_v0 = vpop.eup %1668 }
0x1535   :  { %v1183_v3 = vmul.f32 %v1669_v0, %v1181_v26 }
0x1598   :  { %v1186_v1 = vpop.permute.xlu0 %1185 }
0x1599   :  { %v1188_v2 = vmul.f32 %v1669_v0, %v1186_v1 }
0x159b   :  { %1190 = vrot.lane.b32.xlu0 %v1188_v2, %s1699_s17 }
0x160d   :  { %v1191_v4 = vpop.permute.xlu0 %1190 }
0x160e   :  { %v1193_v5 = vadd.f32 %v1191_v4, %v1183_v3 }
0x1610   :  { %v1201_v6 = vrot.slane %v1193_v5, 6 }
0x1612   :  { %1202 = vrot.lane.b32.xlu0 %v1201_v6, %s1700_s8 }
0x1684   :  { %v1203_v8 = vpop.permute.xlu0 %1202 }
0x1685   :  { %v1205_v9 = vsel %vm1199_vm3, %v1203_v8, %v1087_v45 }
0x1686   :  { %1518 = vmatmul.mubr.msk.f32.vlgmr.msra.gmra.mrb[10].mxu1 %vm151_vm2, %v1205_v9 }
0x1759   :  { %v1286_v10 = vpop.f32.mrb[10].mxu1 }
0x175a   :  { %v1287_v11 = vadd.f32 %v1328_v23, %v1286_v10  ;;  %v1519_v12 = vpop.f32.mrb[11].mxu1 }
0x175c   :  { %1291 = vst.msk [vmem:[#allocation2] sm:$0x3] %vm1290_vm4, %v1287_v11 }
0x175d   :  { %1681 = shalt.err (!%p1678_p4)
}
0x175e   :  { %s1682_s30 = scalar_lea.hbm %s2020_s11, 32 }
0x175f   :  { %p1683_p5 = scmp.ne.s32.totalorder %s2020_s11, %s1682_s30  ;;  %p1686_p6 = scmp.lt.u32.totalorder %s1682_s30, %s2020_s11 }
0x1761   :  { %p1688_p7 = pnand %p1686_p6, %p1683_p5 }
0x1763   :  { %1691 = shalt.err (!%p1688_p7)
}
0x1764   :  { %1301 = dma.vmem_to_hbm [thread:$0]  %s1299_s28, 32, %s2020_s11, [#allocation3]  }
0x1765   :  { %1692 = dma.done.wait [#allocation3], 32  }
0x1766   :  { %1693 = vsyncadd [#allocation3], 4294967264 }
0x1767   :  { %1305 = vsyncpa [#allocation3], 1 }

</bundles_post_ra>
